<compile_context>
chip_gen: v7x
topology: tpu7x:2x2x1
jax: 0.10.0
libtpu: 0.0.40
codegen_flags: <defaults>
</compile_context>

<pallas_src>
import jax
import jax.numpy as jnp
from jax import lax
from jax.experimental import pallas as pl
from jax.experimental.pallas import tpu as pltpu

_LANES = 128
_SUBLANES = 8


def _default_rows_per_step():
    """Rows of (., 128) f32 moved per input per grid step.

    4096 rows -> 2 MiB / input tile -> 8 MiB double-buffered inputs: safe
    inside v5e's 16 MiB default scoped VMEM.  8192 rows (4 MiB / tile,
    16 MiB total) on v6e / v7x (32 MiB default scoped VMEM, faster HBM).
    """
    try:
        kind = jax.devices()[0].device_kind.lower()
    except Exception:
        return 4096
    if "v6" in kind or "v7" in kind:
        return 8192
    return 4096


def _make_kernel(TB, TR, FR, k_tiles, valid_last):
    """Build the reduction kernel.

    Block shapes:
      p_ref, l_ref : (TB, TR, 128)      input tiles (any dtype, cast to f32)
      out_ref      : (TB, 24, 128) f32  resident accumulator slab:
                       rows  0: 8  partial sums of prob*label
                       rows  8:16  partial sums of prob
                       rows 16:24  partial sums of label
    """
    SEG = _SUBLANES  # sublane offset between the three sum segments

    def accum_rows(p_ref, l_ref, out_ref, n_rows):
        # Accumulate over the first `n_rows` (Python int) rows of this tile.
        n_full = n_rows // FR
        rem = n_rows - n_full * FR
        zero = jnp.zeros((TB, FR, _LANES), jnp.float32)

        def load(r0, mask=None):
            ps = p_ref[:, pl.ds(r0, FR), :].astype(jnp.float32)
            ls = l_ref[:, pl.ds(r0, FR), :].astype(jnp.float32)
            if mask is not None:
                ps = jnp.where(mask, ps, 0.0)
                ls = jnp.where(mask, ls, 0.0)
            return ps, ls

        def body(i, carry):
            a_pl, a_p, a_l = carry
            ps, ls = load(pl.multiple_of(i * FR, FR))
            return (a_pl + ps * ls, a_p + ps, a_l + ls)

        a_pl, a_p, a_l = lax.fori_loop(
            0, n_full, body, (zero, zero, zero),
            unroll=min(8, max(n_full, 1)))

        if rem:  # masked sub-chunk of the ragged last row tile
            rows = lax.broadcasted_iota(jnp.int32, (1, FR, _LANES), 1)
            ps, ls = load(n_full * FR, mask=rows < rem)
            a_pl = a_pl + ps * ls
            a_p = a_p + ps
            a_l = a_l + ls

        out_ref[:, 0:FR, :] += a_pl
        out_ref[:, SEG:SEG + FR, :] += a_p
        out_ref[:, 2 * SEG:2 * SEG + FR, :] += a_l

    def kernel(p_ref, l_ref, out_ref):
        k = pl.program_id(1)

        @pl.when(k == 0)
        def _init():
            out_ref[...] = jnp.zeros_like(out_ref)

        if valid_last == TR:  # row-tile divides evenly: single code path
            accum_rows(p_ref, l_ref, out_ref, TR)
        else:
            @pl.when(k < k_tiles - 1)
            def _full():
                accum_rows(p_ref, l_ref, out_ref, TR)

            @pl.when(k == k_tiles - 1)
            def _last():
                accum_rows(p_ref, l_ref, out_ref, valid_last)

    return kernel


def gdice_loss_v2(prob, label, *, rows_per_step=None):
    """prob, label: (N, C, D, H, W).  label may be float or int (one-hot).

    Returns the per-sample loss of shape (N,).
    """
    N, C, D, H, W = prob.shape
    assert label.shape == prob.shape
    NC = N * C
    M = D * H * W

    p = prob.reshape(NC, M)
    l = label.reshape(NC, M)

    # Lane padding only when M is not a multiple of 128 (needed for the free
    # reshape into (rows, 128) vreg-dense tiles).  Row-tile raggedness is
    # masked in-kernel, so padding to the row-tile size never happens.
    if M % _LANES:
        pad = _LANES - M % _LANES
        p = jnp.pad(p, ((0, 0), (0, pad)))
        l = jnp.pad(l, ((0, 0), (0, pad)))
    R = p.shape[1] // _LANES
    p3 = p.reshape(NC, R, _LANES)
    l3 = l.reshape(NC, R, _LANES)

    if rows_per_step is None:
        rows_per_step = _default_rows_per_step()

    if R >= _SUBLANES:
        TR = min((R // _SUBLANES) * _SUBLANES, rows_per_step)  # multiple of 8
        FR = _SUBLANES
    else:                      # tiny volume: whole slice in one sub-8-row tile
        TR = R
        FR = R
    k_tiles = pl.cdiv(R, TR)
    valid_last = R - (k_tiles - 1) * TR

    # Batch several (n, c) slices per grid step when the per-slice volume is
    # small, so each step still moves a large contiguous chunk; cap TB so the
    # resident (TB, 24, 128) accumulator block stays small.
    TB = max(1, min(NC, rows_per_step // TR, 128))
    nc_tiles = pl.cdiv(NC, TB)

    kernel = _make_kernel(TB, TR, FR, k_tiles, valid_last)

    in_spec = pl.BlockSpec((TB, TR, _LANES), lambda b, k: (b, k, 0))
    out_spec = pl.BlockSpec((TB, 3 * _SUBLANES, _LANES), lambda b, k: (b, 0, 0))

    slab = pl.pallas_call(
        kernel,
        out_shape=jax.ShapeDtypeStruct((NC, 3 * _SUBLANES, _LANES), jnp.float32),
        grid=(nc_tiles, k_tiles),
        in_specs=[in_spec, in_spec],
        out_specs=out_spec,
        compiler_params=pltpu.CompilerParams(
            dimension_semantics=("parallel", "arbitrary")),
    )(p3, l3)

    # Tiny O(N*C) epilogue -- identical to the torch code (no eps on `den`,
    # matching the reference semantics: all-background inputs give NaN/inf).
    sums = slab.reshape(NC, 3, _SUBLANES, _LANES).sum(axis=(2, 3))
    union = sums[:, 0].reshape(N, C)
    prob_r = sums[:, 1].reshape(N, C)
    label_r = sums[:, 2].reshape(N, C)

    weight = 1.0 / (label_r * label_r + 1.0)
    num = jnp.sum((union * weight)[:, 1:], axis=1)
    den = jnp.sum(((prob_r + label_r) * weight)[:, 1:], axis=1)
    return 1.0 - 2.0 * num / den


def _reference(prob, label):
    N, C = prob.shape[:2]
    p = prob.reshape(N, C, -1)
    l = label.reshape(N, C, -1)
    union = jnp.sum(p * l, axis=2)
    prob_r = jnp.sum(p, axis=2)
    label_r = jnp.sum(l, axis=2)
    weight = 1.0 / (label_r ** 2 + 1.0)
    num = jnp.sum((union * weight)[:, 1:], axis=1)
    den = jnp.sum(((prob_r + label_r) * weight)[:, 1:], axis=1)
    return 1.0 - 2.0 * num / den


if __name__ == "__main__":
    key = jax.random.PRNGKey(0)

    def make_inputs(k, N, C, D, H, W):
        k1, k2 = jax.random.split(k)
        logits = jax.random.normal(k1, (N, C, D, H, W), dtype=jnp.float32)
        prob = jax.nn.softmax(logits, axis=1)
        idx = jax.random.randint(k2, (N, D, H, W), 0, C, dtype=jnp.int32)
        label = jax.nn.one_hot(idx, C, axis=1, dtype=jnp.float32)  # (N,C,D,H,W)
        return prob, label

    # (N, C, D, H, W, label dtype fed to the kernel)
    cases = [
        (2, 4, 4, 16, 16, jnp.float32),  # M = 1024: aligned, single tile
        (2, 4, 5, 24, 32, jnp.int8),     # M = 3840: ragged row tile + int8 label
        (2, 3, 3, 7, 11, jnp.float32),   # M = 231 : lane pad + sub-8-row path
    ]

    keys = jax.random.split(key, len(cases))
    for sub, (N, C, D, H, W, ldt) in zip(keys, cases):
        prob, label_f32 = make_inputs(sub, N, C, D, H, W)
        out = gdice_loss_v2(prob, label_f32.astype(ldt))
        out = jax.block_until_ready(out)
        ref = _reference(prob, label_f32)
        assert out.shape == (N,), out.shape
        assert jnp.allclose(out, ref, atol=1e-5, rtol=1e-5), (out, ref)

    print("KERNEL_OK")
</pallas_src>

<mosaic_0001>
module attributes {stable_mosaic.version = 11 : i64} {
  func.func @kernel(%arg0: i32, %arg1: i32, %arg2: memref<8x8x128xf32, #tpu.memory_space<vmem>>, %arg3: memref<8x8x128xf32, #tpu.memory_space<vmem>>, %arg4: memref<8x24x128xf32, #tpu.memory_space<vmem>>) attributes {dimension_semantics = [#tpu.dimension_semantics<parallel>, #tpu.dimension_semantics<arbitrary>], iteration_bounds = array<i64: 1, 1>, scalar_prefetch = 0 : i64, scratch_operands = 0 : i64, tpu.core_type = #tpu.core_type<tc>, window_params = [{transform_indices = @transform_0, window_bounds = array<i64: 8, 8, 128>}, {transform_indices = @transform_1, window_bounds = array<i64: 8, 8, 128>}, {transform_indices = @transform_2, window_bounds = array<i64: 8, 24, 128>}]} {
    %c0_i32 = arith.constant 0 : i32
    %0 = arith.cmpi eq, %arg1, %c0_i32 : i32
    %1 = arith.extui %0 : i1 to i32
    %c0_i32_0 = arith.constant 0 : i32
    %2 = arith.cmpi ne, %1, %c0_i32_0 : i32
    scf.if %2 {
      %cst_21 = arith.constant 0.000000e+00 : f32
      %23 = vector.broadcast %cst_21 : f32 to vector<8x24x128xf32>
      %c0_22 = arith.constant 0 : index
      %c0_23 = arith.constant 0 : index
      %c0_24 = arith.constant 0 : index
      %24 = vector.load %arg4[%c0_22, %c0_23, %c0_24] : memref<8x24x128xf32, #tpu.memory_space<vmem>>, vector<8x24x128xf32>
      tpu.vector_store %arg4[%c0_22, %c0_23, %c0_24], %23 {strides = array<i32>} : memref<8x24x128xf32, #tpu.memory_space<vmem>>, vector<8x24x128xf32>,
    } else {
    }
    %cst = arith.constant 0.000000e+00 : f32
    %3 = vector.broadcast %cst : f32 to vector<8x8x128xf32>
    %c0_i32_1 = arith.constant 0 : i32
    %c8_i32 = arith.constant 8 : i32
    %4 = arith.muli %c0_i32_1, %c8_i32 : i32
    %5 = tpu.assume_multiple %4, 8 : i32
    %c0 = arith.constant 0 : index
    %6 = arith.index_cast %5 : i32 to index
    %c0_2 = arith.constant 0 : index
    %7 = vector.load %arg2[%c0, %6, %c0_2] : memref<8x8x128xf32, #tpu.memory_space<vmem>>, vector<8x8x128xf32>
    %c0_3 = arith.constant 0 : index
    %8 = arith.index_cast %5 : i32 to index
    %c0_4 = arith.constant 0 : index
    %9 = vector.load %arg3[%c0_3, %8, %c0_4] : memref<8x8x128xf32, #tpu.memory_space<vmem>>, vector<8x8x128xf32>
    %10 = arith.mulf %7, %9 : vector<8x8x128xf32>
    %11 = arith.addf %3, %10 : vector<8x8x128xf32>
    %12 = arith.addf %3, %7 : vector<8x8x128xf32>
    %13 = arith.addf %3, %9 : vector<8x8x128xf32>
    %c1_i32 = arith.constant 1 : i32
    %c0_5 = arith.constant 0 : index
    %c0_6 = arith.constant 0 : index
    %c0_7 = arith.constant 0 : index
    %14 = vector.load %arg4[%c0_5, %c0_6, %c0_7] : memref<8x24x128xf32, #tpu.memory_space<vmem>>, vector<8x8x128xf32>
    %15 = arith.addf %14, %11 : vector<8x8x128xf32>
    %c0_8 = arith.constant 0 : index
    %c0_9 = arith.constant 0 : index
    %c0_10 = arith.constant 0 : index
    %16 = vector.load %arg4[%c0_8, %c0_9, %c0_10] : memref<8x24x128xf32, #tpu.memory_space<vmem>>, vector<8x8x128xf32>
    tpu.vector_store %arg4[%c0_8, %c0_9, %c0_10], %15 {strides = array<i32>} : memref<8x24x128xf32, #tpu.memory_space<vmem>>, vector<8x8x128xf32>,
    %c0_11 = arith.constant 0 : index
    %c8 = arith.constant 8 : index
    %c0_12 = arith.constant 0 : index
    %17 = vector.load %arg4[%c0_11, %c8, %c0_12] : memref<8x24x128xf32, #tpu.memory_space<vmem>>, vector<8x8x128xf32>
    %18 = arith.addf %17, %12 : vector<8x8x128xf32>
    %c0_13 = arith.constant 0 : index
    %c8_14 = arith.constant 8 : index
    %c0_15 = arith.constant 0 : index
    %19 = vector.load %arg4[%c0_13, %c8_14, %c0_15] : memref<8x24x128xf32, #tpu.memory_space<vmem>>, vector<8x8x128xf32>
    tpu.vector_store %arg4[%c0_13, %c8_14, %c0_15], %18 {strides = array<i32>} : memref<8x24x128xf32, #tpu.memory_space<vmem>>, vector<8x8x128xf32>,
    %c0_16 = arith.constant 0 : index
    %c16 = arith.constant 16 : index
    %c0_17 = arith.constant 0 : index
    %20 = vector.load %arg4[%c0_16, %c16, %c0_17] : memref<8x24x128xf32, #tpu.memory_space<vmem>>, vector<8x8x128xf32>
    %21 = arith.addf %20, %13 : vector<8x8x128xf32>
    %c0_18 = arith.constant 0 : index
    %c16_19 = arith.constant 16 : index
    %c0_20 = arith.constant 0 : index
    %22 = vector.load %arg4[%c0_18, %c16_19, %c0_20] : memref<8x24x128xf32, #tpu.memory_space<vmem>>, vector<8x8x128xf32>
    tpu.vector_store %arg4[%c0_18, %c16_19, %c0_20], %21 {strides = array<i32>} : memref<8x24x128xf32, #tpu.memory_space<vmem>>, vector<8x8x128xf32>,
    return
  }
  func.func @transform_0(%arg0: i32, %arg1: i32) -> (i32, i32, i32) {
    %c0_i32 = arith.constant 0 : i32
    %c0_i32_0 = arith.constant 0 : i32
    return %arg0, %arg1, %c0_i32 : i32, i32, i32
  }
  func.func @transform_1(%arg0: i32, %arg1: i32) -> (i32, i32, i32) {
    %c0_i32 = arith.constant 0 : i32
    %c0_i32_0 = arith.constant 0 : i32
    return %arg0, %arg1, %c0_i32 : i32, i32, i32
  }
  func.func @transform_2(%arg0: i32, %arg1: i32) -> (i32, i32, i32) {
    %c0_i32 = arith.constant 0 : i32
    %c0_i32_0 = arith.constant 0 : i32
    %c0_i32_1 = arith.constant 0 : i32
    return %arg0, %c0_i32, %c0_i32_0 : i32, i32, i32
  }
}

</mosaic_0001>

<bundles_post_ra>
// kernel: tpu_custom_call.1
= control target key start
LH: loop header
LB: loop body
LE: loop exit
PB: predicated region body
PF: predicated region fallthrough
CT: control target
= control target key end

     0   :  { %7 = vsyncpa [#allocation3], 0  ;;  %s349_s0 = inlined_call_operand.hbm [shape: f32[8,8,128], index: 0, kind: input, shape index: {}]   ;;  %s350_s1 = inlined_call_operand.hbm [shape: f32[8,8,128], index: 1, kind: input, shape index: {}]   ;;  %s351_s2 = inlined_call_operand.hbm [shape: f32[8,24,128], index: 2, kind: output, shape index: {}]  }
   0x1   :  { %8 = vsyncpa [#allocation6], 0 }
   0x2   :  { %9 = vsyncpa [#allocation4], 0  ;;  %s284_s9 = smov [#allocation2]   ;;  %s212_s13 = scalar_lea.hbm %s349_s0, 1024 }
   0x3   :  { %s15_s10 = sshll.u32 %s284_s9, 4  ;;  %p213_p0 = scmp.ne.s32.totalorder %s349_s0, %s212_s13  ;;  %s16_s10 = int_to_ptr.vmem [resolvable:$true] %s15_s10 }
   0x4   :  { %p216_p1 = scmp.lt.u32.totalorder %s212_s13, %s349_s0 }
   0x6   :  { %p218_p2 = pnand %p216_p1, %p213_p0 }
   0x8   :  { %221 = shalt.err (!%p218_p2)
}
   0x9   :  { %s222_s18 = scalar_lea.vmem %s16_s10, 1024  ;;  %p227_p4 = scmp.lt.s32.totalorder %s16_s10, %s16_s10 }
   0xa   :  { %p223_p3 = scmp.ne.s32.totalorder %s16_s10, %s222_s18  ;;  %p228_p5 = scmp.lt.s32.totalorder %s222_s18, %s222_s18 }
   0xc   :  { %p229_p6 = por %p228_p5, %p227_p4 }
   0xe   :  { %p230_p7 = pnand %p229_p6, %p223_p3 }
  0x10   :  { %233 = shalt.err (!%p230_p7)
}
  0x11   :  { %s285_s19 = smov 128   ;;  %s286_s20 = smov 8  }
  0x12   :  { %21 = dma.hbm_to_vmem [thread:$0]  %s349_s0, 1024, %s16_s10, [#allocation3], %s285_s19, %s285_s19, %s286_s20  }
  0x13   :  { %s287_s23 = smov [#allocation5]   ;;  %s234_s27 = scalar_lea.hbm %s350_s1, 1024 }
  0x14   :  { %s27_s24 = sshll.u32 %s287_s23, 4  ;;  %p235_p8 = scmp.ne.s32.totalorder %s350_s1, %s234_s27  ;;  %s28_s24 = int_to_ptr.vmem [resolvable:$true] %s27_s24 }
  0x15   :  { %p238_p9 = scmp.lt.u32.totalorder %s234_s27, %s350_s1 }
  0x17   :  { %p240_p10 = pnand %p238_p9, %p235_p8 }
  0x19   :  { %243 = shalt.err (!%p240_p10)
}
  0x1a   :  { %s244_s4 = scalar_lea.vmem %s28_s24, 1024  ;;  %p249_p12 = scmp.lt.s32.totalorder %s28_s24, %s28_s24 }
  0x1b   :  { %p245_p11 = scmp.ne.s32.totalorder %s28_s24, %s244_s4  ;;  %p250_p13 = scmp.lt.s32.totalorder %s244_s4, %s244_s4 }
  0x1d   :  { %p251_p0 = por %p250_p13, %p249_p12 }
  0x1f   :  { %p252_p1 = pnand %p251_p0, %p245_p11 }
  0x21   :  { %255 = shalt.err (!%p252_p1)
}
  0x22   :  { %33 = dma.hbm_to_vmem [thread:$0]  %s350_s1, 1024, %s28_s24, [#allocation6], %s285_s19, %s285_s19, %s286_s20  }
  0x23   :  { %278 = dma.done.wait [#allocation3], 1024  }
  0x24   :  { %279 = vsyncadd [#allocation3], 4294966272 }
  0x25   :  { %280 = dma.done.wait [#allocation6], 1024  }
  0x26   :  { %281 = vsyncadd [#allocation6], 4294966272  ;;  %v68_v0 = vld [vmem:[#allocation2] sm:$0xff]  ;;  %v69_v2 = vld [vmem:[#allocation2 + $0x8] sm:$0xff]  ;;  %s288_s1 = smov [#allocation7]  }
  0x27   :  { %v76_v1 = vld [vmem:[#allocation5] sm:$0xff]  ;;  %v77_v4 = vld [vmem:[#allocation5 + $0x8] sm:$0xff]  ;;  %v70_v5 = vld [vmem:[#allocation2 + $0x10] sm:$0xff]  ;;  %156 = vst [vmem:[#allocation7 + $0x8] sm:$0xff] %v68_v0  ;;  %s193_s6 = sshll.u32 %s288_s1, 4  ;;  %s194_s6 = int_to_ptr.vmem [resolvable:$true] %s193_s6 }
  0x28   :  { %v84_v3 = vmul.f32 %v76_v1, %v68_v0  ;;  %v78_v6 = vld [vmem:[#allocation5 + $0x10] sm:$0xff]  ;;  %v85_v7 = vmul.f32 %v77_v4, %v69_v2  ;;  %v71_v9 = vld [vmem:[#allocation2 + $0x18] sm:$0xff]  ;;  %v72_v11 = vld [vmem:[#allocation2 + $0x20] sm:$0xff]  ;;  %157 = vst [vmem:[#allocation7 + $0x20] sm:$0xff] %v69_v2  ;;  %s256_s7 = scalar_lea.vmem %s194_s6, 3072  ;;  %p261_p3 = scmp.lt.s32.totalorder %s194_s6, %s194_s6 }
  0x29   :  { %v86_v8 = vmul.f32 %v78_v6, %v70_v5  ;;  %v79_v10 = vld [vmem:[#allocation5 + $0x18] sm:$0xff]  ;;  %v80_v13 = vld [vmem:[#allocation5 + $0x20] sm:$0xff]  ;;  %v73_v14 = vld [vmem:[#allocation2 + $0x28] sm:$0xff]  ;;  %180 = vst [vmem:[#allocation7 + $0x10] sm:$0xff] %v76_v1  ;;  %p257_p2 = scmp.ne.s32.totalorder %s194_s6, %s256_s7  ;;  %p262_p4 = scmp.lt.s32.totalorder %s256_s7, %s256_s7 }
  0x2a   :  { %v87_v12 = vmul.f32 %v79_v10, %v71_v9  ;;  %v81_v15 = vld [vmem:[#allocation5 + $0x28] sm:$0xff]  ;;  %v88_v16 = vmul.f32 %v80_v13, %v72_v11  ;;  %v74_v18 = vld [vmem:[#allocation2 + $0x30] sm:$0xff]  ;;  %v75_v20 = vld [vmem:[#allocation2 + $0x38] sm:$0xff]  ;;  %158 = vst [vmem:[#allocation7 + $0x38] sm:$0xff] %v70_v5 }
  0x2b   :  { %v89_v17 = vmul.f32 %v81_v15, %v73_v14  ;;  %v82_v19 = vld [vmem:[#allocation5 + $0x30] sm:$0xff]  ;;  %181 = vst [vmem:[#allocation7 + $0x28] sm:$0xff] %v77_v4  ;;  %132 = vst [vmem:[#allocation7] sm:$0xff] %v84_v3  ;;  %v83_v22 = vld [vmem:[#allocation5 + $0x38] sm:$0xff]  ;;  %p263_p5 = por %p262_p4, %p261_p3 }
  0x2c   :  { %v90_v21 = vmul.f32 %v82_v19, %v74_v18  ;;  %159 = vst [vmem:[#allocation7 + $0x50] sm:$0xff] %v71_v9  ;;  %160 = vst [vmem:[#allocation7 + $0x68] sm:$0xff] %v72_v11  ;;  %v91_v23 = vmul.f32 %v83_v22, %v75_v20 }
  0x2d   :  { %133 = vst [vmem:[#allocation7 + $0x18] sm:$0xff] %v85_v7  ;;  %134 = vst [vmem:[#allocation7 + $0x30] sm:$0xff] %v86_v8  ;;  %p264_p6 = pnand %p263_p5, %p257_p2 }
  0x2e   :  { %135 = vst [vmem:[#allocation7 + $0x48] sm:$0xff] %v87_v12  ;;  %161 = vst [vmem:[#allocation7 + $0x80] sm:$0xff] %v73_v14 }
  0x2f   :  { %162 = vst [vmem:[#allocation7 + $0x98] sm:$0xff] %v74_v18  ;;  %136 = vst [vmem:[#allocation7 + $0x60] sm:$0xff] %v88_v16 }
  0x30   :  { %137 = vst [vmem:[#allocation7 + $0x78] sm:$0xff] %v89_v17  ;;  %163 = vst [vmem:[#allocation7 + $0xb0] sm:$0xff] %v75_v20 }
  0x31   :  { %138 = vst [vmem:[#allocation7 + $0x90] sm:$0xff] %v90_v21  ;;  %182 = vst [vmem:[#allocation7 + $0x40] sm:$0xff] %v78_v6 }
  0x32   :  { %183 = vst [vmem:[#allocation7 + $0x58] sm:$0xff] %v79_v10  ;;  %184 = vst [vmem:[#allocation7 + $0x70] sm:$0xff] %v80_v13 }
  0x33   :  { %139 = vst [vmem:[#allocation7 + $0xa8] sm:$0xff] %v91_v23  ;;  %185 = vst [vmem:[#allocation7 + $0x88] sm:$0xff] %v81_v15 }
  0x34   :  { %186 = vst [vmem:[#allocation7 + $0xa0] sm:$0xff] %v82_v19  ;;  %187 = vst [vmem:[#allocation7 + $0xb8] sm:$0xff] %v83_v22 }
  0x35   :  { %267 = shalt.err (!%p264_p6)
}
  0x36   :  { %s268_s10 = scalar_lea.hbm %s351_s2, 3072 }
  0x37   :  { %p269_p7 = scmp.ne.s32.totalorder %s351_s2, %s268_s10  ;;  %p272_p8 = scmp.lt.u32.totalorder %s268_s10, %s351_s2 }
  0x39   :  { %p274_p9 = pnand %p272_p8, %p269_p7 }
  0x3b   :  { %277 = shalt.err (!%p274_p9)
}
  0x3c   :  { %199 = dma.vmem_to_hbm [thread:$0]  %s194_s6, 3072, %s351_s2, [#allocation4], %s285_s19, %s285_s19, %s286_s20  }
  0x3d   :  { %282 = dma.done.wait [#allocation4], 3072  }
  0x3e   :  { %283 = vsyncadd [#allocation4], 4294964224 }
  0x3f   :  { %203 = vsyncpa [#allocation3], 1 }
  0x40   :  { %204 = vsyncpa [#allocation6], 1 }
  0x41   :  { %205 = vsyncpa [#allocation4], 1 }

</bundles_post_ra>
